<compile_context>
chip_gen: v7x
topology: tpu7x:2x2x1
jax: 0.10.0
libtpu: 0.0.40
codegen_flags: <defaults>
</compile_context>

<pallas_src>
import functools

import jax
import jax.numpy as jnp
from jax import lax
from jax.experimental import pallas as pl
from jax.experimental.pallas import tpu as pltpu


def _round_up(x, m):
    return ((x + m - 1) // m) * m


def _sublane_multiple(dtype):
    # dtype-aware sublane rounding: f32 -> 8, bf16 -> 16, int8/fp8 -> 32
    return {1: 32, 2: 16, 4: 8}.get(jnp.dtype(dtype).itemsize, 8)


# ----------------------------- Pallas kernel --------------------------------

def _linear_block_kernel(*refs, leaky_slope, use_scratch, precision):
    """acc += LeakyReLU(a1)*inv_s1 @ w1^T + a2*inv_s2 @ w2^T  over the K axis.

    Bias (b_main + b_map) is folded into the k==0 accumulator init.  Weights
    arrive in native (N, K) layout; inv-sigmas arrive as a (1, 2) SMEM array.
    """
    if use_scratch:
        s_ref, a1_ref, w1_ref, a2_ref, w2_ref, b_ref, o_ref, acc_ref = refs
    else:
        s_ref, a1_ref, w1_ref, a2_ref, w2_ref, b_ref, o_ref = refs
        acc_ref = o_ref          # f32 output block is resident across K

    k = pl.program_id(2)

    @pl.when(k == 0)
    def _init():
        acc_ref[...] = jnp.broadcast_to(
            b_ref[...].astype(jnp.float32), acc_ref.shape)

    inv_s1 = s_ref[0, 0]
    inv_s2 = s_ref[0, 1]

    a1 = a1_ref[...]
    a1 = jnp.where(a1 >= 0, a1, a1 * leaky_slope)            # LeakyReLU fused
    a1 = (a1 * inv_s1).astype(w1_ref.dtype)                   # sigma fold (VPU)
    a2 = (a2_ref[...] * inv_s2).astype(w2_ref.dtype)

    dims = (((1,), (1,)), ((), ()))                            # a @ w^T
    acc = lax.dot_general(a1, w1_ref[...], dims,
                          precision=precision,
                          preferred_element_type=jnp.float32)
    acc = acc + lax.dot_general(a2, w2_ref[...], dims,
                                precision=precision,
                                preferred_element_type=jnp.float32)
    acc_ref[...] += acc

    if use_scratch:
        @pl.when(k == pl.num_programs(2) - 1)
        def _fin():
            o_ref[...] = acc_ref[...].astype(o_ref.dtype)


def linear_block_fused(x, w_main, masked, w_map, bias, inv_sigmas, *,
                       negative_slope=0.2,
                       precision=lax.Precision.HIGHEST):
    """x: (M, K1), w_main: (N, K1), masked: (M, K2), w_map: (N, K2),
    bias: (N,) [= b_main + b_map], inv_sigmas: (1, 2) f32.  Returns (M, N)."""
    M, K1 = x.shape
    M2, K2 = masked.shape
    N, K1w = w_main.shape
    N2, K2w = w_map.shape
    assert M == M2 and K1 == K1w and K2 == K2w and N == N2
    assert bias.shape == (N,)

    out_dtype = x.dtype
    use_scratch = out_dtype != jnp.float32

    # ---- generation-gated caps (v5e/v6e: 128 MiB VMEM, v7x: 64 MiB) --------
    try:
        vmem_cap = int(pltpu.get_tpu_info().vmem_capacity_bytes)
    except Exception:
        vmem_cap = 64 * 1024 * 1024          # conservative (v7x) fallback
    if vmem_cap >= 100 * 1024 * 1024:        # v5e / v6e
        tk_cap, tn_cap, vmem_limit = 2048, 1024, 96 * 1024 * 1024
    else:                                    # v7x
        tk_cap, tn_cap, vmem_limit = 1024, 512, 32 * 1024 * 1024

    # ---- M tiling (dtype-aware sublane rounding, whole small batch) --------
    sub = _sublane_multiple(x.dtype)
    mb = pl.cdiv(M, 256)
    tm = _round_up(pl.cdiv(M, mb), sub)
    Mp = tm * mb

    # ---- shared K-block count so one K grid axis drives both branches ------
    kb = max(pl.cdiv(K1, tk_cap), pl.cdiv(K2, tk_cap), 1)
    tk1 = _round_up(pl.cdiv(K1, kb), 128)
    tk2 = _round_up(pl.cdiv(K2, kb), 128)
    K1p, K2p = tk1 * kb, tk2 * kb

    # ---- N tiling -----------------------------------------------------------
    nb = pl.cdiv(N, tn_cap)
    tn = _round_up(pl.cdiv(N, nb), 128)
    Np = tn * nb
    # Give v7x's second TensorCore a parallel block when N is large enough;
    # skip for small N where the kernel is latency-bound.
    if Mp // tm == 1 and Np // tn == 1 and Np >= 512 and Np % 256 == 0:
        tn = Np // 2

    grid = (Mp // tm, Np // tn, kb)

    def pad2(a, rows, cols):
        pr, pc = rows - a.shape[0], cols - a.shape[1]
        return a if (pr == 0 and pc == 0) else jnp.pad(a, ((0, pr), (0, pc)))

    x_p = pad2(x, Mp, K1p)
    m_p = pad2(masked, Mp, K2p)
    w1_p = pad2(w_main, Np, K1p)             # native (N, K): no transpose pass
    w2_p = pad2(w_map, Np, K2p)
    b_p = pad2(bias.reshape(1, -1), 1, Np)
    s_p = inv_sigmas.astype(jnp.float32)     # (1, 2) -> SMEM scalars

    in_specs = [
        pl.BlockSpec(memory_space=pltpu.MemorySpace.SMEM),       # 1/sigma x2
        pl.BlockSpec((tm, tk1), lambda i, j, k: (i, k)),          # x
        pl.BlockSpec((tn, tk1), lambda i, j, k: (j, k)),          # w_main (N,K)
        pl.BlockSpec((tm, tk2), lambda i, j, k: (i, k)),          # masked
        pl.BlockSpec((tn, tk2), lambda i, j, k: (j, k)),          # w_map  (N,K)
        pl.BlockSpec((1, tn), lambda i, j, k: (0, j)),            # bias
    ]
    out_spec = pl.BlockSpec((tm, tn), lambda i, j, k: (i, j))
    scratch = [pltpu.VMEM((tm, tn), jnp.float32)] if use_scratch else []

    kernel = functools.partial(_linear_block_kernel,
                               leaky_slope=negative_slope,
                               use_scratch=use_scratch,
                               precision=precision)

    out = pl.pallas_call(
        kernel,
        out_shape=jax.ShapeDtypeStruct((Mp, Np), out_dtype),
        grid_spec=pltpu.PrefetchScalarGridSpec(
            num_scalar_prefetch=0,
            grid=grid,
            in_specs=in_specs,
            out_specs=out_spec,
            scratch_shapes=scratch),
        compiler_params=pltpu.CompilerParams(
            dimension_semantics=("parallel", "parallel", "arbitrary"),
            vmem_limit_bytes=vmem_limit),
    )(s_p, x_p, w1_p, m_p, w2_p, b_p)

    return out[:M, :N]


# ------------------------- spectral norm (host glue) -------------------------

def spectral_sigma(w, u, n_power_iterations=1, eps=1e-12):
    """Top-singular-value estimate of w (out, in) via power iteration starting
    from the stored u (out,), matching torch spectral_norm's forward (training
    mode).  Returns (sigma, updated_u); only matvecs, no full-matrix rewrite."""
    def l2n(v):
        return v / (jnp.linalg.norm(v) + eps)

    u = l2n(u)
    v = l2n(w.T @ u)
    u = l2n(w @ v)
    for _ in range(n_power_iterations - 1):
        v = l2n(w.T @ u)
        u = l2n(w @ v)
    sigma = u @ (w @ v)
    return sigma, u
# TODO(synk): the updated u is not written back into params (PyTorch updates
# its u buffer in-place during a training-mode forward).


# --------------------------- LinearBlock forward -----------------------------

def linear_block_forward(x, masked_features, params, *, negative_slope=0.2):
    """x: (B, in_features), masked_features: (B, feature_size) -> (B, out)."""
    sigma_main, _ = spectral_sigma(params['w_main'], params['u_main'])
    sigma_map, _ = spectral_sigma(params['w_map'], params['u_map'])
    inv_sigmas = jnp.stack([1.0 / sigma_main, 1.0 / sigma_map]).reshape(1, 2)
    bias = params['b_main'] + params['b_map']        # tiny (N,) add
    return linear_block_fused(x, params['w_main'],
                              masked_features, params['w_map'],
                              bias, inv_sigmas,
                              negative_slope=negative_slope)


if __name__ == "__main__":
    key = jax.random.PRNGKey(0)
    ks = jax.random.split(key, 8)

    batch, in_features, out_features, feature_size = 2, 32, 64, 48
    x = jax.random.normal(ks[0], (batch, in_features), jnp.float32)
    masked = jax.random.normal(ks[1], (batch, feature_size), jnp.float32)

    params = {
        'w_main': jax.random.normal(ks[2], (out_features, in_features),
                                    jnp.float32) / jnp.sqrt(in_features),
        'b_main': 0.01 * jax.random.normal(ks[3], (out_features,), jnp.float32),
        'u_main': jax.random.normal(ks[4], (out_features,), jnp.float32),
        'w_map': jax.random.normal(ks[5], (out_features, feature_size),
                                   jnp.float32) / jnp.sqrt(feature_size),
        'b_map': 0.01 * jax.random.normal(ks[6], (out_features,), jnp.float32),
        'u_map': jax.random.normal(ks[7], (out_features,), jnp.float32),
    }

    out = jax.jit(linear_block_forward)(x, masked, params)
    out = jax.block_until_ready(out)
    assert out.shape == (batch, out_features), out.shape

    # pure-JAX reference (same HIGHEST-precision matmuls as the kernel).
    hp = lax.Precision.HIGHEST
    s1, _ = spectral_sigma(params['w_main'], params['u_main'])
    s2, _ = spectral_sigma(params['w_map'], params['u_map'])
    a = jnp.where(x >= 0, x, 0.2 * x)
    ref = (jnp.dot(a, (params['w_main'] / s1).T, precision=hp)
           + params['b_main']
           + jnp.dot(masked, (params['w_map'] / s2).T, precision=hp)
           + params['b_map'])
    err = float(jnp.max(jnp.abs(out - ref)))
    assert jnp.allclose(out, ref, atol=1e-4, rtol=1e-4), err
    assert bool(jnp.all(jnp.isfinite(out)))
    print("KERNEL_OK")
</pallas_src>

<mosaic_0001>
module attributes {stable_mosaic.version = 11 : i64} {
  func.func @_linear_block_kernel(%arg0: i32, %arg1: i32, %arg2: i32, %arg3: memref<1x2xf32, #tpu.memory_space<smem>>, %arg4: memref<8x128xf32, #tpu.memory_space<vmem>>, %arg5: memref<128x128xf32, #tpu.memory_space<vmem>>, %arg6: memref<8x128xf32, #tpu.memory_space<vmem>>, %arg7: memref<128x128xf32, #tpu.memory_space<vmem>>, %arg8: memref<1x128xf32, #tpu.memory_space<vmem>>, %arg9: memref<8x128xf32, #tpu.memory_space<vmem>>) attributes {dimension_semantics = [#tpu.dimension_semantics<parallel>, #tpu.dimension_semantics<parallel>, #tpu.dimension_semantics<arbitrary>], iteration_bounds = array<i64: 1, 1, 1>, scalar_prefetch = 0 : i64, scratch_operands = 0 : i64, tpu.core_type = #tpu.core_type<tc>, window_params = [{transform_indices = @transform_0, window_bounds = array<i64: 1, 2>}, {transform_indices = @transform_1, window_bounds = array<i64: 8, 128>}, {transform_indices = @transform_2, window_bounds = array<i64: 128, 128>}, {transform_indices = @transform_3, window_bounds = array<i64: 8, 128>}, {transform_indices = @transform_4, window_bounds = array<i64: 128, 128>}, {transform_indices = @transform_5, window_bounds = array<i64: 1, 128>}, {transform_indices = @transform_6, window_bounds = array<i64: 8, 128>}]} {
    %c0_i32 = arith.constant 0 : i32
    %0 = arith.cmpi eq, %arg2, %c0_i32 : i32
    %1 = arith.extui %0 : i1 to i32
    %c0_i32_0 = arith.constant 0 : i32
    %2 = arith.cmpi ne, %1, %c0_i32_0 : i32
    scf.if %2 {
      %c0_18 = arith.constant 0 : index
      %c0_19 = arith.constant 0 : index
      %24 = vector.load %arg8[%c0_18, %c0_19] : memref<1x128xf32, #tpu.memory_space<vmem>>, vector<1x128xf32>
      %25 = vector.shape_cast %24 : vector<1x128xf32> to vector<1x128xf32>
      %26 = vector.broadcast %25 : vector<1x128xf32> to vector<8x128xf32>
      %c0_20 = arith.constant 0 : index
      %c0_21 = arith.constant 0 : index
      %27 = vector.load %arg9[%c0_20, %c0_21] : memref<8x128xf32, #tpu.memory_space<vmem>>, vector<8x128xf32>
      tpu.vector_store %arg9[%c0_20, %c0_21], %26 {strides = array<i32>} : memref<8x128xf32, #tpu.memory_space<vmem>>, vector<8x128xf32>,
    } else {
    }
    %c0 = arith.constant 0 : index
    %c0_1 = arith.constant 0 : index
    %3 = memref.load %arg3[%c0, %c0_1] : memref<1x2xf32, #tpu.memory_space<smem>>
    %c0_2 = arith.constant 0 : index
    %c1 = arith.constant 1 : index
    %4 = memref.load %arg3[%c0_2, %c1] : memref<1x2xf32, #tpu.memory_space<smem>>
    %c0_3 = arith.constant 0 : index
    %c0_4 = arith.constant 0 : index
    %5 = vector.load %arg4[%c0_3, %c0_4] : memref<8x128xf32, #tpu.memory_space<vmem>>, vector<8x128xf32>
    %cst = arith.constant 0.000000e+00 : f32
    %6 = vector.broadcast %cst : f32 to vector<8x128xf32>
    %7 = arith.cmpf oge, %5, %6 : vector<8x128xf32>
    %cst_5 = arith.constant 2.000000e-01 : f32
    %8 = vector.broadcast %cst_5 : f32 to vector<8x128xf32>
    %9 = arith.mulf %5, %8 : vector<8x128xf32>
    %10 = arith.select %7, %5, %9 : vector<8x128xi1>, vector<8x128xf32>
    %11 = vector.broadcast %3 : f32 to vector<8x128xf32>
    %12 = arith.mulf %10, %11 : vector<8x128xf32>
    %c0_6 = arith.constant 0 : index
    %c0_7 = arith.constant 0 : index
    %13 = vector.load %arg6[%c0_6, %c0_7] : memref<8x128xf32, #tpu.memory_space<vmem>>, vector<8x128xf32>
    %14 = vector.broadcast %4 : f32 to vector<8x128xf32>
    %15 = arith.mulf %13, %14 : vector<8x128xf32>
    %c0_8 = arith.constant 0 : index
    %c0_9 = arith.constant 0 : index
    %16 = vector.load %arg5[%c0_8, %c0_9] : memref<128x128xf32, #tpu.memory_space<vmem>>, vector<128x128xf32>
    %cst_10 = arith.constant dense<0.000000e+00> : vector<8x128xf32>
    %17 = tpu.matmul %12, %16, %cst_10 {dimension_numbers = #tpu.dot_dimension_numbers<[1], [1], [0], [0], [0, 0, 1, 0], [], []>, precision = #tpu.contract_precision<fp32>} : vector<8x128xf32>, vector<128x128xf32>, vector<8x128xf32> -> vector<8x128xf32>
    %c0_11 = arith.constant 0 : index
    %c0_12 = arith.constant 0 : index
    %18 = vector.load %arg7[%c0_11, %c0_12] : memref<128x128xf32, #tpu.memory_space<vmem>>, vector<128x128xf32>
    %cst_13 = arith.constant dense<0.000000e+00> : vector<8x128xf32>
    %19 = tpu.matmul %15, %18, %cst_13 {dimension_numbers = #tpu.dot_dimension_numbers<[1], [1], [0], [0], [0, 0, 1, 0], [], []>, precision = #tpu.contract_precision<fp32>} : vector<8x128xf32>, vector<128x128xf32>, vector<8x128xf32> -> vector<8x128xf32>
    %20 = arith.addf %17, %19 : vector<8x128xf32>
    %c0_14 = arith.constant 0 : index
    %c0_15 = arith.constant 0 : index
    %21 = vector.load %arg9[%c0_14, %c0_15] : memref<8x128xf32, #tpu.memory_space<vmem>>, vector<8x128xf32>
    %22 = arith.addf %21, %20 : vector<8x128xf32>
    %c0_16 = arith.constant 0 : index
    %c0_17 = arith.constant 0 : index
    %23 = vector.load %arg9[%c0_16, %c0_17] : memref<8x128xf32, #tpu.memory_space<vmem>>, vector<8x128xf32>
    tpu.vector_store %arg9[%c0_16, %c0_17], %22 {strides = array<i32>} : memref<8x128xf32, #tpu.memory_space<vmem>>, vector<8x128xf32>,
    return
  }
  func.func @transform_0(%arg0: i32, %arg1: i32, %arg2: i32) -> (i32, i32) {
    %c0_i32 = arith.constant 0 : i32
    %c0_i32_0 = arith.constant 0 : i32
    %c0_i32_1 = arith.constant 0 : i32
    return %c0_i32, %c0_i32_0 : i32, i32
  }
  func.func @transform_1(%arg0: i32, %arg1: i32, %arg2: i32) -> (i32, i32) {
    %c0_i32 = arith.constant 0 : i32
    return %arg0, %arg2 : i32, i32
  }
  func.func @transform_2(%arg0: i32, %arg1: i32, %arg2: i32) -> (i32, i32) {
    %c0_i32 = arith.constant 0 : i32
    return %arg1, %arg2 : i32, i32
  }
  func.func @transform_3(%arg0: i32, %arg1: i32, %arg2: i32) -> (i32, i32) {
    %c0_i32 = arith.constant 0 : i32
    return %arg0, %arg2 : i32, i32
  }
  func.func @transform_4(%arg0: i32, %arg1: i32, %arg2: i32) -> (i32, i32) {
    %c0_i32 = arith.constant 0 : i32
    return %arg1, %arg2 : i32, i32
  }
  func.func @transform_5(%arg0: i32, %arg1: i32, %arg2: i32) -> (i32, i32) {
    %c0_i32 = arith.constant 0 : i32
    %c0_i32_0 = arith.constant 0 : i32
    return %c0_i32, %arg1 : i32, i32
  }
  func.func @transform_6(%arg0: i32, %arg1: i32, %arg2: i32) -> (i32, i32) {
    %c0_i32 = arith.constant 0 : i32
    return %arg0, %arg1 : i32, i32
  }
}

</mosaic_0001>

<bundles_post_ra>
// kernel: linear_block_forward.1
= control target key start
LH: loop header
LB: loop body
LE: loop exit
PB: predicated region body
PF: predicated region fallthrough
CT: control target
= control target key end

     0   :  { %11 = vsyncpa [#allocation3], 0  ;;  %s2941_s0 = inlined_call_operand.vmem [shape: f32[1,2], index: 0, kind: input, shape index: {}]   ;;  %s2942_s1 = inlined_call_operand.vmem [shape: f32[8,128], index: 1, kind: input, shape index: {}]   ;;  %s2943_s2 = inlined_call_operand.vmem [shape: f32[128,128], index: 2, kind: input, shape index: {}]   ;;  %s2944_s3 = inlined_call_operand.vmem [shape: f32[8,128], index: 3, kind: input, shape index: {}]   ;;  %s2945_s4 = inlined_call_operand.vmem [shape: f32[128,128], index: 4, kind: input, shape index: {}]   ;;  %s2946_s5 = inlined_call_operand.vmem [shape: f32[1,128], index: 5, kind: input, shape index: {}]   ;;  %s2947_s6 = inlined_call_operand.vmem [shape: f32[8,128], index: 6, kind: output, shape index: {}]  }
   0x1   :  { %s18_s23 = sshll.u32 %s2941_s0, 4  ;;  %s19_s23 = int_to_ptr.vmem [resolvable:$true] %s18_s23 }
   0x2   :  { %s2299_s24 = scalar_lea.vmem %s19_s23, 16  ;;  %p2304_p1 = scmp.lt.s32.totalorder %s19_s23, %s19_s23 }
   0x3   :  { %p2300_p0 = scmp.ne.s32.totalorder %s19_s23, %s2299_s24  ;;  %p2305_p2 = scmp.lt.s32.totalorder %s2299_s24, %s2299_s24 }
   0x5   :  { %p2306_p3 = por %p2305_p2, %p2304_p1 }
   0x7   :  { %p2307_p4 = pnand %p2306_p3, %p2300_p0 }
   0x9   :  { %2310 = shalt.err (!%p2307_p4)
}
   0xa   :  { %s2313_s25 = smov [#allocation2]  }
   0xb   :  { %21 = dma.vmem_to_smem %s19_s23, 16, %s2313_s25, [#allocation3]  }
   0xc   :  { %2311 = dma.done.wait [#allocation3], 16  }
   0xd   :  { %2312 = vsyncadd [#allocation3], 4294967280 }
   0xe   :  { %35 = sfence }
   0xf   :  { %v75_v0 = vld [vmem:[%s2945_s4] sm:$0xff]  ;;  %v76_v1 = vld [vmem:[%s2945_s4 + $0x8] sm:$0xff]  ;;  %v77_v2 = vld [vmem:[%s2945_s4 + $0x10] sm:$0xff]  ;;  %v2314_v3 = vmov 0.0|0.0   ;;  %vm2315_vm0 = vmmov 0   ;;  %v2316_v11 = vmov 0.0  }
  0x10   :  { %2007 = vmatprep.subr.bf16.mxu0 %v2314_v3  ;;  %v92_v4 = vand.u32 4294901760, %v75_v0  ;;  %v95_v5 = vand.u32 4294901760, %v76_v1  ;;  %2031 = vmatprep.subr.bf16.mxu1 %v2314_v3  ;;  %v78_v6 = vld [vmem:[%s2945_s4 + $0x18] sm:$0xff]  ;;  %v98_v7 = vand.u32 4294901760, %v77_v2  ;;  %v79_v8 = vld [vmem:[%s2945_s4 + $0x20] sm:$0xff]  ;;  %v80_v9 = vld [vmem:[%s2945_s4 + $0x28] sm:$0xff] }
  0x11   :  { %v101_v10 = vand.u32 4294901760, %v78_v6  ;;  %1619 = vmatprep.mubr.msk.f32.mxu0 %vm2315_vm0, %v2316_v11  ;;  %1654 = vmatprep.mubr.msk.f32.mxu1 %vm2315_vm0, %v2316_v11  ;;  %v104_v17 = vand.u32 4294901760, %v79_v8  ;;  %v107_v18 = vand.u32 4294901760, %v80_v9  ;;  %v81_v32 = vld [vmem:[%s2945_s4 + $0x30] sm:$0xff]  ;;  %v82_v33 = vld [vmem:[%s2945_s4 + $0x38] sm:$0xff]  ;;  %v83_v43 = vld [vmem:[%s2945_s4 + $0x40] sm:$0xff] }
  0x12   :  { %v2379_v12 = vpack.c.bf16 %v95_v5, %v92_v4  ;;  %v2381_v13 = vsub.f32 %v75_v0, %v92_v4  ;;  %v2383_v14 = vsub.f32 %v76_v1, %v95_v5  ;;  %v2385_v15 = vsub.f32 %v77_v2, %v98_v7  ;;  %v84_v48 = vld [vmem:[%s2945_s4 + $0x48] sm:$0xff]  ;;  %v85_v57 = vld [vmem:[%s2945_s4 + $0x50] sm:$0xff]  ;;  %v86_v58 = vld [vmem:[%s2945_s4 + $0x58] sm:$0xff]  ;;  %s1382_s29 = sld [smem:[#allocation2 + $0x1]]  ;;  %s48_s8 = sld [smem:[#allocation2]] }
  0x13   :  { %v2387_v16 = vsub.f32 %v78_v6, %v101_v10  ;;  %v2397_v25 = vpack.c.bf16 %v101_v10, %v98_v7  ;;  %v2399_v26 = vsub.f32 %v79_v8, %v104_v17  ;;  %v2401_v27 = vsub.f32 %v80_v9, %v107_v18 }
  0x14   :  { %2009 = vmatpush3.bf16.xpose.msra.mxu0 %v2379_v12  ;;  %v185_v19 = vand.u32 4294901760, %v2381_v13  ;;  %v192_v20 = vand.u32 4294901760, %v2383_v14  ;;  %v199_v21 = vand.u32 4294901760, %v2385_v15  ;;  %v110_v35 = vand.u32 4294901760, %v81_v32 }
  0x15   :  { %2010 = vmatprep.subr.bf16.mxu0 %v2314_v3  ;;  %v206_v22 = vand.u32 4294901760, %v2387_v16  ;;  %v113_v36 = vand.u32 4294901760, %v82_v33  ;;  %v213_v39 = vand.u32 4294901760, %v2399_v26  ;;  %v220_v40 = vand.u32 4294901760, %v2401_v27 }
  0x16   :  { %v186_v23 = vsub.f32 %v2381_v13, %v185_v19  ;;  %v193_v24 = vsub.f32 %v2383_v14, %v192_v20  ;;  %v200_v30 = vsub.f32 %v2385_v15, %v199_v21  ;;  %v2416_v41 = vpack.c.bf16 %v107_v18, %v104_v17 }
  0x17   :  { %v207_v31 = vsub.f32 %v2387_v16, %v206_v22  ;;  %v2418_v42 = vsub.f32 %v81_v32, %v110_v35  ;;  %v2423_v45 = vsub.f32 %v82_v33, %v113_v36  ;;  %v214_v46 = vsub.f32 %v2399_v26, %v213_v39 }
  0x18   :  { %v187_v28 = vand.u32 4294901760, %v186_v23  ;;  %v194_v29 = vand.u32 4294901760, %v193_v24  ;;  %v201_v37 = vand.u32 4294901760, %v200_v30  ;;  %v221_v47 = vsub.f32 %v2401_v27, %v220_v40  ;;  %v87_v23 = vld [vmem:[%s2945_s4 + $0x60] sm:$0xff]  ;;  %v88_v24 = vld [vmem:[%s2945_s4 + $0x68] sm:$0xff] }
  0x19   :  { %v208_v38 = vand.u32 4294901760, %v207_v31  ;;  %v116_v49 = vand.u32 4294901760, %v83_v43  ;;  %v119_v50 = vand.u32 4294901760, %v84_v48  ;;  %v215_v51 = vand.u32 4294901760, %v214_v46  ;;  %v56_v46 = vld [vmem:[%s2944_s3] sm:$0xff] }
  0x1a   :  { %v2032_v34 = vpack.c.bf16 %v194_v29, %v187_v28  ;;  %v222_v52 = vand.u32 4294901760, %v221_v47  ;;  %v227_v53 = vand.u32 4294901760, %v2418_v42  ;;  %v234_v54 = vand.u32 4294901760, %v2423_v45 }
  0x1b   :  { %v2035_v44 = vpack.c.bf16 %v208_v38, %v201_v37  ;;  %v2435_v55 = vsub.f32 %v83_v43, %v116_v49  ;;  %v2437_v56 = vsub.f32 %v84_v48, %v119_v50  ;;  %v2445_v59 = vpack.c.bf16 %v113_v36, %v110_v35  ;;  %v89_v38 = vld [vmem:[%s2945_s4 + $0x70] sm:$0xff] }
  0x1c   :  { %2012 = vmatpush3.bf16.xpose.msra.mxu0 %v2397_v25  ;;  %2033 = vmatpush3.bf16.xpose.msra.mxu1 %v2032_v34  ;;  %v2038_v60 = vpack.c.bf16 %v222_v52, %v215_v51  ;;  %v228_v61 = vsub.f32 %v2418_v42, %v227_v53  ;;  %v235_v62 = vsub.f32 %v2423_v45, %v234_v54  ;;  %v122_v63 = vand.u32 4294901760, %v85_v57 }
  0x1d   :  { %2013 = vmatprep.subr.bf16.mxu0 %v2314_v3  ;;  %2034 = vmatprep.subr.bf16.mxu1 %v2314_v3  ;;  %v125_v0 = vand.u32 4294901760, %v86_v58  ;;  %v241_v1 = vand.u32 4294901760, %v2435_v55  ;;  %v248_v2 = vand.u32 4294901760, %v2437_v56  ;;  %v2451_v4 = vpack.c.bf16 %v192_v20, %v185_v19 }
  0x1e   :  { %v2453_v5 = vpack.c.bf16 %v206_v22, %v199_v21  ;;  %v2455_v6 = vpack.c.bf16 %v220_v40, %v213_v39  ;;  %v229_v7 = vand.u32 4294901760, %v228_v61  ;;  %v236_v8 = vand.u32 4294901760, %v235_v62 }
  0x1f   :  { %v2458_v9 = vpack.c.bf16 %v234_v54, %v227_v53  ;;  %v2462_v10 = vpack.c.bf16 %v248_v2, %v241_v1  ;;  %v2464_v17 = vsub.f32 %v85_v57, %v122_v63  ;;  %v2466_v18 = vsub.f32 %v86_v58, %v125_v0 }
  0x20   :  { %v2468_v19 = vpack.c.bf16 %v119_v50, %v116_v49  ;;  %v2041_v20 = vpack.c.bf16 %v236_v8, %v229_v7  ;;  %v242_v21 = vsub.f32 %v2435_v55, %v241_v1  ;;  %v249_v22 = vsub.f32 %v2437_v56, %v248_v2 }
  0x21   :  { %v128_v28 = vand.u32 4294901760, %v87_v23  ;;  %v131_v29 = vand.u32 4294901760, %v88_v24  ;;  %v255_v30 = vand.u32 4294901760, %v2464_v17  ;;  %v262_v31 = vand.u32 4294901760, %v2466_v18 }
  0x22   :  { %v243_v32 = vand.u32 4294901760, %v242_v21  ;;  %v250_v33 = vand.u32 4294901760, %v249_v22  ;;  %v2485_v35 = vpack.c.bf16 %v125_v0, %v122_v63  ;;  %v57_v47 = vstv %s1382_s29 }
  0x23   :  { %v2483_v34 = vpack.c.bf16 %v262_v31, %v255_v30  ;;  %v2487_v36 = vsub.f32 %v87_v23, %v128_v28  ;;  %v2489_v37 = vsub.f32 %v88_v24, %v131_v29  ;;  %v256_v40 = vsub.f32 %v2464_v17, %v255_v30 }
  0x24   :  { %2015 = vmatpush3.bf16.xpose.msra.mxu0 %v2416_v41  ;;  %2036 = vmatpush3.bf16.xpose.msra.mxu1 %v2035_v44  ;;  %v2044_v39 = vpack.c.bf16 %v250_v33, %v243_v32  ;;  %v263_v43 = vsub.f32 %v2466_v18, %v262_v31  ;;  %v90_v44 = vld [vmem:[%s2945_s4 + $0x78] sm:$0xff]  ;;  %v134_v48 = vand.u32 4294901760, %v89_v38  ;;  %v58_v52 = vmul.f32 %v57_v47, %v56_v46 }
  0x25   :  { %2016 = vmatprep.subr.bf16.mxu0 %v2314_v3  ;;  %2037 = vmatprep.subr.bf16.mxu1 %v2314_v3  ;;  %v137_v49 = vand.u32 4294901760, %v90_v44  ;;  %v269_v50 = vand.u32 4294901760, %v2487_v36  ;;  %v276_v51 = vand.u32 4294901760, %v2489_v37  ;;  %v257_v53 = vand.u32 4294901760, %v256_v40 }
  0x26   :  { %v264_v54 = vand.u32 4294901760, %v263_v43  ;;  %v2509_v58 = vsub.f32 %v89_v38, %v134_v48  ;;  %v2513_v61 = vand.u32 4294901760, %v58_v52  ;;  %v2515_v62 = vpack.c.bf16 %v131_v29, %v128_v28 }
  0x27   :  { %v2507_v57 = vpack.c.bf16 %v276_v51, %v269_v50  ;;  %v270_v0 = vsub.f32 %v2487_v36, %v269_v50  ;;  %v277_v1 = vsub.f32 %v2489_v37, %v276_v51  ;;  %v2530_v24 = vpack.c.bf16 %v137_v49, %v134_v48 }
  0x28   :  { %v2047_v63 = vpack.c.bf16 %v264_v54, %v257_v53  ;;  %v2520_v2 = vsub.f32 %v58_v52, %v2513_v61  ;;  %v283_v7 = vand.u32 4294901760, %v2509_v58  ;;  %v2056_v40 = vpack.c.bf16 %v2383_v14, %v2381_v13 }
  0x29   :  { %v278_v21 = vand.u32 4294901760, %v277_v1  ;;  %v2059_v43 = vpack.c.bf16 %v2387_v16, %v2385_v15  ;;  %v2062_v13 = vpack.c.bf16 %v2401_v27, %v2399_v26  ;;  %v2065_v14 = vpack.c.bf16 %v2423_v45, %v2418_v42 }
  0x2a   :  { %v174_v23 = vand.u32 4294901760, %v2520_v2  ;;  %v284_v29 = vsub.f32 %v2509_v58, %v283_v7  ;;  %v2068_v15 = vpack.c.bf16 %v2437_v56, %v2435_v55  ;;  %v2071_v16 = vpack.c.bf16 %v2466_v18, %v2464_v17  ;;  %v61_v56 = vld [vmem:[%s2943_s2 + $0x10] sm:$0xff] }
  0x2b   :  { %v2074_v26 = vpack.c.bf16 %v2489_v37, %v2487_v36  ;;  %v64_v36 = vld [vmem:[%s2943_s2 + $0x28] sm:$0xff] }
  0x2c   :  { %2018 = vmatpush3.bf16.xpose.msra.mxu0 %v2445_v59  ;;  %2039 = vmatpush3.bf16.xpose.msra.mxu1 %v2038_v60  ;;  %v2511_v60 = vsub.f32 %v90_v44, %v137_v49  ;;  %v175_v31 = vsub.f32 %v2520_v2, %v174_v23  ;;  %v285_v32 = vand.u32 4294901760, %v284_v29  ;;  %v748_v49 = vand.u32 4294901760, %v64_v36 }
  0x2d   :  { %2019 = vmatprep.subr.bf16.mxu0 %v2314_v3  ;;  %2040 = vmatprep.subr.bf16.mxu1 %v2314_v3 }
  0x2e   :  { %v290_v8 = vand.u32 4294901760, %v2511_v60  ;;  %v176_v38 = vand.u32 4294901760, %v175_v31  ;;  %v2077_v27 = vpack.c.bf16 %v2511_v60, %v2509_v58  ;;  %v65_v58 = vld [vmem:[%s2943_s2 + $0x30] sm:$0xff] }
  0x30   :  { %v2527_v22 = vpack.c.bf16 %v290_v8, %v283_v7  ;;  %v291_v30 = vsub.f32 %v2511_v60, %v290_v8  ;;  %v66_v60 = vld [vmem:[%s2943_s2 + $0x38] sm:$0xff] }
  0x31   :  { %v754_v1 = vand.u32 4294901760, %v66_v60 }
  0x32   :  { %v292_v33 = vand.u32 4294901760, %v291_v30 }
  0x34   :  { %2021 = vmatpush3.bf16.xpose.msra.mxu0 %v2468_v19  ;;  %2042 = vmatpush3.bf16.xpose.msra.mxu1 %v2041_v20  ;;  %v271_v20 = vand.u32 4294901760, %v270_v0  ;;  %v751_v0 = vand.u32 4294901760, %v65_v58 }
  0x35   :  { %2022 = vmatprep.subr.bf16.mxu0 %v2314_v3  ;;  %2043 = vmatprep.subr.bf16.mxu1 %v2314_v3 }
  0x36   :  { %v2050_v28 = vpack.c.bf16 %v278_v21, %v271_v20  ;;  %v2696_v20 = vsub.f32 %v65_v58, %v751_v0  ;;  %v2698_v21 = vsub.f32 %v66_v60, %v754_v1 }
  0x3c   :  { %2024 = vmatpush3.bf16.xpose.msra.mxu0 %v2485_v35  ;;  %2045 = vmatpush3.bf16.xpose.msra.mxu1 %v2044_v39  ;;  %v2053_v39 = vpack.c.bf16 %v292_v33, %v285_v32  ;;  %v868_v33 = vand.u32 4294901760, %v2696_v20 }
  0x3d   :  { %2025 = vmatprep.subr.bf16.mxu0 %v2314_v3  ;;  %2046 = vmatprep.subr.bf16.mxu1 %v2314_v3 }
  0x44   :  { %2027 = vmatpush3.bf16.xpose.msra.mxu0 %v2515_v62  ;;  %2048 = vmatpush3.bf16.xpose.msra.mxu1 %v2047_v63 }
  0x45   :  { %2028 = vmatprep.subr.bf16.mxu0 %v2314_v3  ;;  %2049 = vmatprep.subr.bf16.mxu1 %v2314_v3 }
  0x4c   :  { %2030 = vmatpush3.bf16.xpose.msra.mxu0 %v2530_v24  ;;  %2051 = vmatpush3.bf16.xpose.msra.mxu1 %v2050_v28  ;;  %v68_v28 = vld [vmem:[%s2943_s2 + $0x48] sm:$0xff] }
  0x4d   :  { %2052 = vmatprep.subr.bf16.mxu1 %v2314_v3  ;;  %2055 = vmatprep.subr.bf16.mxu0 %v2314_v3  ;;  %v760_v30 = vand.u32 4294901760, %v68_v28 }
  0x53   :  { %1620 = vmatmul.mubr.f32.vlgmr.msra.gmra.mrb[0].mxu0 %v176_v38  ;;  %v875_v38 = vand.u32 4294901760, %v2698_v21 }
  0x54   :  { %2054 = vmatpush3.bf16.xpose.msra.mxu1 %v2053_v39  ;;  %2057 = vmatpush3.bf16.xpose.msra.mxu0 %v2056_v40  ;;  %v2719_v40 = vsub.f32 %v68_v28, %v760_v30  ;;  %v73_v28 = vld [vmem:[%s2943_s2 + $0x70] sm:$0xff] }
  0x55   :  { %2058 = vmatprep.subr.bf16.mxu0 %v2314_v3  ;;  %2079 = vmatprep.subr.bf16.mxu1 %v2314_v3 }
  0x56   :  { %1689 = vmatprep.mubr.msk.f32.mxu0 %vm2315_vm0, %v2316_v11 }
  0x5b   :  { %1655 = vmatmul.mubr.f32.vlgmr.msra.gmra.mrb[0].mxu1 %v2513_v61 }
  0x5c   :  { %2060 = vmatpush3.bf16.xpose.msra.mxu0 %v2059_v43  ;;  %2081 = vmatpush3.bf16.xpose.msra.mxu1 %v2379_v12  ;;  %v2721_v43 = vpack.c.bf16 %v754_v1, %v751_v0 }
  0x5d   :  { %2061 = vmatprep.subr.bf16.mxu0 %v2314_v3  ;;  %2082 = vmatprep.subr.bf16.mxu1 %v2314_v3 }
  0x5e   :  { %1724 = vmatprep.mubr.msk.f32.mxu1 %vm2315_vm0, %v2316_v11 }
  0x64   :  { %2063 = vmatpush3.bf16.xpose.msra.mxu0 %v2062_v13  ;;  %2084 = vmatpush3.bf16.xpose.msra.mxu1 %v2397_v25 }
  0x65   :  { %2064 = vmatprep.subr.bf16.mxu0 %v2314_v3  ;;  %2085 = vmatprep.subr.bf16.mxu1 %v2314_v3 }
  0x6c   :  { %2066 = vmatpush3.bf16.xpose.msra.mxu0 %v2065_v14  ;;  %2087 = vmatpush3.bf16.xpose.msra.mxu1 %v2416_v41  ;;  %v869_v14 = vsub.f32 %v2696_v20, %v868_v33 }
  0x6d   :  { %2067 = vmatprep.subr.bf16.mxu0 %v2314_v3  ;;  %2088 = vmatprep.subr.bf16.mxu1 %v2314_v3 }
  0x74   :  { %2069 = vmatpush3.bf16.xpose.msra.mxu0 %v2068_v15  ;;  %2090 = vmatpush3.bf16.xpose.msra.mxu1 %v2445_v59  ;;  %v876_v15 = vsub.f32 %v2698_v21, %v875_v38 }
  0x75   :  { %2070 = vmatprep.subr.bf16.mxu0 %v2314_v3  ;;  %2091 = vmatprep.subr.bf16.mxu1 %v2314_v3 }
  0x7c   :  { %2072 = vmatpush3.bf16.xpose.msra.mxu0 %v2071_v16  ;;  %2093 = vmatpush3.bf16.xpose.msra.mxu1 %v2468_v19  ;;  %v69_v16 = vld [vmem:[%s2943_s2 + $0x50] sm:$0xff] }
  0x7d   :  { %2073 = vmatprep.subr.bf16.mxu0 %v2314_v3  ;;  %2094 = vmatprep.subr.bf16.mxu1 %v2314_v3 }
  0x84   :  { %2075 = vmatpush3.bf16.xpose.msra.mxu0 %v2074_v26  ;;  %2096 = vmatpush3.bf16.xpose.msra.mxu1 %v2485_v35  ;;  %v70_v26 = vld [vmem:[%s2943_s2 + $0x58] sm:$0xff] }
  0x85   :  { %2076 = vmatprep.subr.bf16.mxu0 %v2314_v3  ;;  %2097 = vmatprep.subr.bf16.mxu1 %v2314_v3 }
  0x8c   :  { %2078 = vmatpush3.bf16.xpose.msra.mxu0 %v2077_v27  ;;  %2099 = vmatpush3.bf16.xpose.msra.mxu1 %v2515_v62  ;;  %v763_v27 = vand.u32 4294901760, %v69_v16 }
  0x8d   :  { %2100 = vmatprep.subr.bf16.mxu1 %v2314_v3  ;;  %2103 = vmatprep.subr.bf16.mxu0 %v2314_v3 }
  0x93   :  { %1690 = vmatmul.mubr.f32.vlgmr.msra.gmra.mrb[2].mxu0 %v2520_v2 }
  0x94   :  { %2102 = vmatpush3.bf16.xpose.msra.mxu1 %v2530_v24  ;;  %2105 = vmatpush3.bf16.xpose.msra.mxu0 %v2451_v4  ;;  %v739_v4 = vand.u32 4294901760, %v61_v56 }
  0x95   :  { %2106 = vmatprep.subr.bf16.mxu0 %v2314_v3  ;;  %2127 = vmatprep.subr.bf16.mxu1 %v2314_v3 }
  0x96   :  { %1759 = vmatprep.mubr.msk.f32.mxu0 %vm2315_vm0, %v2316_v11 }
  0x9b   :  { %1725 = vmatmul.mubr.f32.vlgmr.msra.gmra.mrb[2].mxu1 %v174_v23 }
  0x9c   :  { %2108 = vmatpush3.bf16.xpose.msra.mxu0 %v2453_v5  ;;  %2129 = vmatpush3.bf16.xpose.msra.mxu1 %v2379_v12  ;;  %v59_v12 = vld [vmem:[%s2943_s2] sm:$0xff] }
  0x9d   :  { %2109 = vmatprep.subr.bf16.mxu0 %v2314_v3  ;;  %2130 = vmatprep.subr.bf16.mxu1 %v2314_v3 }
  0x9e   :  { %1794 = vmatprep.mubr.msk.f32.mxu1 %vm2315_vm0, %v2316_v11 }
  0xa4   :  { %2111 = vmatpush3.bf16.xpose.msra.mxu0 %v2455_v6  ;;  %2132 = vmatpush3.bf16.xpose.msra.mxu1 %v2397_v25  ;;  %v60_v25 = vld [vmem:[%s2943_s2 + $0x8] sm:$0xff] }
  0xa5   :  { %2112 = vmatprep.subr.bf16.mxu0 %v2314_v3  ;;  %2133 = vmatprep.subr.bf16.mxu1 %v2314_v3  ;;  %v736_v42 = vand.u32 4294901760, %v60_v25 }
  0xa7   :  { %v2627_v55 = vsub.f32 %v60_v25, %v736_v42 }
  0xac   :  { %2114 = vmatpush3.bf16.xpose.msra.mxu0 %v2458_v9  ;;  %2135 = vmatpush3.bf16.xpose.msra.mxu1 %v2416_v41  ;;  %v733_v41 = vand.u32 4294901760, %v59_v12  ;;  %v833_v9 = vand.u32 4294901760, %v2627_v55 }
  0xad   :  { %2115 = vmatprep.subr.bf16.mxu0 %v2314_v3  ;;  %2136 = vmatprep.subr.bf16.mxu1 %v2314_v3 }
  0xae   :  { %v2625_v45 = vsub.f32 %v59_v12, %v733_v41  ;;  %v2645_v18 = vpack.c.bf16 %v736_v42, %v733_v41  ;;  %v766_v12 = vand.u32 4294901760, %v70_v26  ;;  %v889_v41 = vand.u32 4294901760, %v2719_v40 }
  0xaf   :  { %v870_v42 = vand.u32 4294901760, %v869_v14 }
  0xb0   :  { %v826_v6 = vand.u32 4294901760, %v2625_v45 }
  0xb4   :  { %2117 = vmatpush3.bf16.xpose.msra.mxu0 %v2462_v10  ;;  %2138 = vmatpush3.bf16.xpose.msra.mxu1 %v2445_v59  ;;  %v62_v59 = vld [vmem:[%s2943_s2 + $0x18] sm:$0xff]  ;;  %v2641_v10 = vsub.f32 %v61_v56, %v739_v4  ;;  %v877_v56 = vand.u32 4294901760, %v876_v15 }
  0xb5   :  { %2118 = vmatprep.subr.bf16.mxu0 %v2314_v3  ;;  %2139 = vmatprep.subr.bf16.mxu1 %v2314_v3  ;;  %v742_v5 = vand.u32 4294901760, %v62_v59 }
  0xb6   :  { %v840_v37 = vand.u32 4294901760, %v2641_v10 }
  0xb7   :  { %v2643_v17 = vsub.f32 %v62_v59, %v742_v5  ;;  %v2674_v52 = vpack.c.bf16 %v742_v5, %v739_v4  ;;  %v2740_v59 = vsub.f32 %v69_v16, %v763_v27  ;;  %v2742_v4 = vsub.f32 %v70_v26, %v766_v12 }
  0xb8   :  { %v841_v50 = vsub.f32 %v2641_v10, %v840_v37 }
  0xb9   :  { %v847_v44 = vand.u32 4294901760, %v2643_v17 }
  0xbb   :  { %v848_v51 = vsub.f32 %v2643_v17, %v847_v44 }
  0xbc   :  { %2120 = vmatpush3.bf16.xpose.msra.mxu0 %v2483_v34  ;;  %2141 = vmatpush3.bf16.xpose.msra.mxu1 %v2468_v19  ;;  %v827_v19 = vsub.f32 %v2625_v45, %v826_v6  ;;  %v834_v34 = vsub.f32 %v2627_v55, %v833_v9 }
  0xbd   :  { %2121 = vmatprep.subr.bf16.mxu0 %v2314_v3  ;;  %2142 = vmatprep.subr.bf16.mxu1 %v2314_v3  ;;  %v849_v63 = vand.u32 4294901760, %v848_v51  ;;  %v903_v51 = vand.u32 4294901760, %v2742_v4 }
  0xbe   :  { %v828_v46 = vand.u32 4294901760, %v827_v19  ;;  %v835_v47 = vand.u32 4294901760, %v834_v34  ;;  %v890_v19 = vsub.f32 %v2719_v40, %v889_v41 }
  0xbf   :  { %v904_v1 = vsub.f32 %v2742_v4, %v903_v51 }
  0xc0   :  { %v2176_v53 = vpack.c.bf16 %v835_v47, %v828_v46  ;;  %v72_v46 = vld [vmem:[%s2943_s2 + $0x68] sm:$0xff]  ;;  %v50_v47 = vld [vmem:[%s2942_s1] sm:$0xff] }
  0xc1   :  { %v772_v58 = vand.u32 4294901760, %v72_v46  ;;  %v52_v60 = vmul.f32 0.2, %v50_v47  ;;  %vm51_vm1 = vcmp.ge.f32.partialorder %v50_v47, 0.0 }
  0xc4   :  { %2123 = vmatpush3.bf16.xpose.msra.mxu0 %v2507_v57  ;;  %2144 = vmatpush3.bf16.xpose.msra.mxu1 %v2485_v35  ;;  %v63_v35 = vld [vmem:[%s2943_s2 + $0x20] sm:$0xff]  ;;  %v2678_v57 = vsub.f32 %v64_v36, %v748_v49 }
  0xc5   :  { %2124 = vmatprep.subr.bf16.mxu0 %v2314_v3  ;;  %2145 = vmatprep.subr.bf16.mxu1 %v2314_v3  ;;  %v745_v48 = vand.u32 4294901760, %v63_v35  ;;  %v71_v36 = vld [vmem:[%s2943_s2 + $0x60] sm:$0xff] }
  0xc6   :  { %v861_v7 = vand.u32 4294901760, %v2678_v57 }
  0xc7   :  { %v2676_v54 = vsub.f32 %v63_v35, %v745_v48  ;;  %v2694_v8 = vpack.c.bf16 %v748_v49, %v745_v48  ;;  %v2185_v35 = vpack.c.bf16 %v877_v56, %v870_v42  ;;  %v891_v49 = vand.u32 4294901760, %v890_v19 }
  0xc8   :  { %v862_v23 = vsub.f32 %v2678_v57, %v861_v7 }
  0xc9   :  { %v854_v2 = vand.u32 4294901760, %v2676_v54 }
  0xca   :  { %v863_v32 = vand.u32 4294901760, %v862_v23  ;;  %v53_v23 = vsel %vm51_vm1, %v50_v47, %v52_v60 }
  0xcc   :  { %2126 = vmatpush3.bf16.xpose.msra.mxu0 %v2527_v22  ;;  %2147 = vmatpush3.bf16.xpose.msra.mxu1 %v2515_v62  ;;  %v842_v62 = vand.u32 4294901760, %v841_v50  ;;  %v855_v22 = vsub.f32 %v2676_v54, %v854_v2  ;;  %v896_v50 = vand.u32 4294901760, %v2740_v59 }
  0xcd   :  { %2148 = vmatprep.subr.bf16.mxu1 %v2314_v3  ;;  %2151 = vmatprep.subr.bf16.mxu0 %v2314_v3 }
  0xce   :  { %v856_v31 = vand.u32 4294901760, %v855_v22  ;;  %v897_v0 = vsub.f32 %v2740_v59, %v896_v50  ;;  %v2776_v22 = vsub.f32 %v72_v46, %v772_v58 }
  0xd0   :  { %v2182_v13 = vpack.c.bf16 %v863_v32, %v856_v31  ;;  %v905_v31 = vand.u32 4294901760, %v904_v1  ;;  %v917_v16 = vand.u32 4294901760, %v2776_v22 }
  0xd2   :  { %v918_v19 = vsub.f32 %v2776_v22, %v917_v16 }
  0xd3   :  { %1760 = vmatmul.mubr.f32.vlgmr.msra.gmra.mrb[4].mxu0 %v2513_v61 }
  0xd4   :  { %2150 = vmatpush3.bf16.xpose.msra.mxu1 %v2530_v24  ;;  %2153 = vmatpush3.bf16.xpose.msra.mxu0 %v2645_v18  ;;  %v67_v24 = vld [vmem:[%s2943_s2 + $0x40] sm:$0xff]  ;;  %v919_v46 = vand.u32 4294901760, %v918_v19 }
  0xd5   :  { %2154 = vmatprep.subr.bf16.mxu0 %v2314_v3  ;;  %2175 = vmatprep.subr.bf16.mxu1 %v2314_v3  ;;  %v757_v29 = vand.u32 4294901760, %v67_v24 }
  0xd6   :  { %1829 = vmatprep.mubr.msk.f32.mxu0 %vm2315_vm0, %v2316_v11 }
  0xd7   :  { %v2717_v39 = vsub.f32 %v67_v24, %v757_v29  ;;  %v2750_v34 = vpack.c.bf16 %v760_v30, %v757_v29  ;;  %v54_v24 = vstv %s48_s8  ;;  %v74_v29 = vld [vmem:[%s2943_s2 + $0x78] sm:$0xff]  ;;  %v898_v30 = vand.u32 4294901760, %v897_v0 }
  0xd8   :  { %v55_v32 = vmul.f32 %v54_v24, %v53_v23  ;;  %v778_v14 = vand.u32 4294901760, %v74_v29 }
  0xd9   :  { %v882_v25 = vand.u32 4294901760, %v2717_v39 }
  0xda   :  { %v2795_v56 = vsub.f32 %v74_v29, %v778_v14  ;;  %v2200_v29 = vpack.c.bf16 %v2627_v55, %v2625_v45  ;;  %v2251_v45 = vpack.c.bf16 %v847_v44, %v840_v37  ;;  %v2254_v55 = vpack.c.bf16 %v861_v7, %v854_v2 }
  0xdb   :  { %1795 = vmatmul.mubr.f32.vlgmr.msra.gmra.mrb[4].mxu1 %v2513_v61  ;;  %v2179_v61 = vpack.c.bf16 %v849_v63, %v842_v62  ;;  %v883_v5 = vsub.f32 %v2717_v39, %v882_v25  ;;  %v2766_v62 = vpack.c.bf16 %v766_v12, %v763_v27  ;;  %v2191_v27 = vpack.c.bf16 %v905_v31, %v898_v30 }
  0xdc   :  { %2156 = vmatpush3.bf16.xpose.msra.mxu0 %v2674_v52  ;;  %2177 = vmatpush3.bf16.xpose.msra.mxu1 %v2176_v53  ;;  %v769_v53 = vand.u32 4294901760, %v71_v36  ;;  %v2791_v12 = vand.u32 4294901760, %v55_v32  ;;  %v2203_v30 = vpack.c.bf16 %v2643_v17, %v2641_v10  ;;  %v2206_v31 = vpack.c.bf16 %v2678_v57, %v2676_v54 }
  0xdd   :  { %2157 = vmatprep.subr.bf16.mxu0 %v2314_v3  ;;  %2178 = vmatprep.subr.bf16.mxu1 %v2314_v3  ;;  %v884_v48 = vand.u32 4294901760, %v883_v5  ;;  %v2260_v44 = vpack.c.bf16 %v889_v41, %v882_v25 }
  0xde   :  { %1864 = vmatprep.mubr.msk.f32.mxu1 %vm2315_vm0, %v2316_v11  ;;  %v2789_v26 = vpack.c.bf16 %v772_v58, %v769_v53 }
  0xdf   :  { %v2188_v63 = vpack.c.bf16 %v891_v49, %v884_v48  ;;  %v931_v48 = vand.u32 4294901760, %v2795_v56 }
  0xe4   :  { %2159 = vmatpush3.bf16.xpose.msra.mxu0 %v2694_v8  ;;  %2180 = vmatpush3.bf16.xpose.msra.mxu1 %v2179_v61  ;;  %v2774_v61 = vsub.f32 %v71_v36, %v769_v53 }
  0xe5   :  { %2160 = vmatprep.subr.bf16.mxu0 %v2314_v3  ;;  %2181 = vmatprep.subr.bf16.mxu1 %v2314_v3 }
  0xe6   :  { %v910_v15 = vand.u32 4294901760, %v2774_v61 }
  0xe8   :  { %v911_v5 = vsub.f32 %v2774_v61, %v910_v15  ;;  %v2266_v54 = vpack.c.bf16 %v917_v16, %v910_v15  ;;  %v1381_v15 = vld [vmem:[%s2946_s5] ss:$0 sm:$0xff] }
  0xea   :  { %v912_v36 = vand.u32 4294901760, %v911_v5 }
  0xec   :  { %2162 = vmatpush3.bf16.xpose.msra.mxu0 %v2721_v43  ;;  %2183 = vmatpush3.bf16.xpose.msra.mxu1 %v2182_v13  ;;  %v775_v13 = vand.u32 4294901760, %v73_v28  ;;  %v2194_v58 = vpack.c.bf16 %v919_v46, %v912_v36  ;;  %v2212_v36 = vpack.c.bf16 %v2719_v40, %v2717_v39  ;;  %v2215_v46 = vpack.c.bf16 %v2742_v4, %v2740_v59 }
  0xed   :  { %2163 = vmatprep.subr.bf16.mxu0 %v2314_v3  ;;  %2184 = vmatprep.subr.bf16.mxu1 %v2314_v3 }
  0xee   :  { %v2793_v42 = vsub.f32 %v73_v28, %v775_v13  ;;  %v2812_v53 = vpack.c.bf16 %v778_v14, %v775_v13  ;;  %v2209_v14 = vpack.c.bf16 %v2698_v21, %v2696_v20 }
  0xf0   :  { %v924_v47 = vand.u32 4294901760, %v2793_v42 }
  0xf2   :  { %v925_v60 = vsub.f32 %v2793_v42, %v924_v47  ;;  %v2269_v57 = vpack.c.bf16 %v931_v48, %v924_v47 }
  0xf4   :  { %2165 = vmatpush3.bf16.xpose.msra.mxu0 %v2750_v34  ;;  %2186 = vmatpush3.bf16.xpose.msra.mxu1 %v2185_v35  ;;  %v2804_v35 = vsub.f32 %v55_v32, %v2791_v12  ;;  %v926_v1 = vand.u32 4294901760, %v925_v60  ;;  %v2221_v60 = vpack.c.bf16 %v2795_v56, %v2793_v42 }
  0xf5   :  { %2166 = vmatprep.subr.bf16.mxu0 %v2314_v3  ;;  %2187 = vmatprep.subr.bf16.mxu1 %v2314_v3 }
  0xf6   :  { %v815_v49 = vand.u32 4294901760, %v2804_v35 }
  0xf8   :  { %v816_v0 = vsub.f32 %v2804_v35, %v815_v49 }
  0xfa   :  { %v817_v24 = vand.u32 4294901760, %v816_v0 }
  0xfc   :  { %2168 = vmatpush3.bf16.xpose.msra.mxu0 %v2766_v62  ;;  %2189 = vmatpush3.bf16.xpose.msra.mxu1 %v2188_v63  ;;  %v932_v63 = vsub.f32 %v2795_v56, %v931_v48 }
  0xfd   :  { %2169 = vmatprep.subr.bf16.mxu0 %v2314_v3  ;;  %2190 = vmatprep.subr.bf16.mxu1 %v2314_v3 }
  0xfe   :  { %v933_v23 = vand.u32 4294901760, %v932_v63  ;;  %v2248_v63 = vpack.c.bf16 %v833_v9, %v826_v6 }
 0x100   :  { %v2197_v28 = vpack.c.bf16 %v933_v23, %v926_v1 }
 0x104   :  { %2171 = vmatpush3.bf16.xpose.msra.mxu0 %v2789_v26  ;;  %2192 = vmatpush3.bf16.xpose.msra.mxu1 %v2191_v27 }
 0x105   :  { %2172 = vmatprep.subr.bf16.mxu0 %v2314_v3  ;;  %2193 = vmatprep.subr.bf16.mxu1 %v2314_v3 }
 0x10c   :  { %2174 = vmatpush3.bf16.xpose.msra.mxu0 %v2812_v53  ;;  %2195 = vmatpush3.bf16.xpose.msra.mxu1 %v2194_v58  ;;  %v2218_v58 = vpack.c.bf16 %v2776_v22, %v2774_v61 }
 0x10d   :  { %2196 = vmatprep.subr.bf16.mxu1 %v2314_v3  ;;  %2199 = vmatprep.subr.bf16.mxu0 %v2314_v3 }
 0x113   :  { %1830 = vmatmul.mubr.f32.vlgmr.msra.gmra.mrb[6].mxu0 %v817_v24 }
 0x114   :  { %2198 = vmatpush3.bf16.xpose.msra.mxu1 %v2197_v28  ;;  %2201 = vmatpush3.bf16.xpose.msra.mxu0 %v2200_v29 }
 0x115   :  { %2202 = vmatprep.subr.bf16.mxu0 %v2314_v3  ;;  %2223 = vmatprep.subr.bf16.mxu1 %v2314_v3 }
 0x116   :  { %1899 = vmatprep.mubr.msk.f32.mxu0 %vm2315_vm0, %v2316_v11 }
 0x11b   :  { %1865 = vmatmul.mubr.f32.vlgmr.msra.gmra.mrb[6].mxu1 %v2791_v12 }
 0x11c   :  { %2204 = vmatpush3.bf16.xpose.msra.mxu0 %v2203_v30  ;;  %2225 = vmatpush3.bf16.xpose.msra.mxu1 %v2645_v18 }
 0x11d   :  { %2205 = vmatprep.subr.bf16.mxu0 %v2314_v3  ;;  %2226 = vmatprep.subr.bf16.mxu1 %v2314_v3 }
 0x11e   :  { %1934 = vmatprep.mubr.msk.f32.mxu1 %vm2315_vm0, %v2316_v11 }
 0x124   :  { %2207 = vmatpush3.bf16.xpose.msra.mxu0 %v2206_v31  ;;  %2228 = vmatpush3.bf16.xpose.msra.mxu1 %v2674_v52 }
 0x125   :  { %2208 = vmatprep.subr.bf16.mxu0 %v2314_v3  ;;  %2229 = vmatprep.subr.bf16.mxu1 %v2314_v3 }
 0x126   :  { %v178_v32 = vpop.f32.mrb[0].mxu0 }
 0x127   :  { %v1621_v13 = vpop.f32.mrb[1].mxu0 }
 0x12c   :  { %2210 = vmatpush3.bf16.xpose.msra.mxu0 %v2209_v14  ;;  %2231 = vmatpush3.bf16.xpose.msra.mxu1 %v2694_v8 }
 0x12d   :  { %2211 = vmatprep.subr.bf16.mxu0 %v2314_v3  ;;  %2232 = vmatprep.subr.bf16.mxu1 %v2314_v3 }
 0x12e   :  { %v329_v27 = vpop.f32.mrb[0].mxu1 }
 0x12f   :  { %v330_v5 = vadd.f32 %v329_v27, %v178_v32  ;;  %v1656_v19 = vpop.f32.mrb[1].mxu1 }
 0x134   :  { %2213 = vmatpush3.bf16.xpose.msra.mxu0 %v2212_v36  ;;  %2234 = vmatpush3.bf16.xpose.msra.mxu1 %v2721_v43 }
 0x135   :  { %2214 = vmatprep.subr.bf16.mxu0 %v2314_v3  ;;  %2235 = vmatprep.subr.bf16.mxu1 %v2314_v3 }
 0x13c   :  { %2216 = vmatpush3.bf16.xpose.msra.mxu0 %v2215_v46  ;;  %2237 = vmatpush3.bf16.xpose.msra.mxu1 %v2750_v34 }
 0x13d   :  { %2217 = vmatprep.subr.bf16.mxu0 %v2314_v3  ;;  %2238 = vmatprep.subr.bf16.mxu1 %v2314_v3 }
 0x144   :  { %2219 = vmatpush3.bf16.xpose.msra.mxu0 %v2218_v58  ;;  %2240 = vmatpush3.bf16.xpose.msra.mxu1 %v2766_v62 }
 0x145   :  { %2220 = vmatprep.subr.bf16.mxu0 %v2314_v3  ;;  %2241 = vmatprep.subr.bf16.mxu1 %v2314_v3 }
 0x14c   :  { %2222 = vmatpush3.bf16.xpose.msra.mxu0 %v2221_v60  ;;  %2243 = vmatpush3.bf16.xpose.msra.mxu1 %v2789_v26 }
 0x14d   :  { %2244 = vmatprep.subr.bf16.mxu1 %v2314_v3  ;;  %2247 = vmatprep.subr.bf16.mxu0 %v2314_v3 }
 0x153   :  { %1900 = vmatmul.mubr.f32.vlgmr.msra.gmra.mrb[8].mxu0 %v2804_v35 }
 0x154   :  { %2246 = vmatpush3.bf16.xpose.msra.mxu1 %v2812_v53  ;;  %2249 = vmatpush3.bf16.xpose.msra.mxu0 %v2248_v63 }
 0x155   :  { %2250 = vmatprep.subr.bf16.mxu0 %v2314_v3  ;;  %2271 = vmatprep.subr.bf16.mxu1 %v2314_v3 }
 0x156   :  { %1969 = vmatprep.mubr.msk.f32.mxu0 %vm2315_vm0, %v2316_v11 }
 0x15b   :  { %1935 = vmatmul.mubr.f32.vlgmr.msra.gmra.mrb[8].mxu1 %v815_v49 }
 0x15c   :  { %2252 = vmatpush3.bf16.xpose.msra.mxu0 %v2251_v45  ;;  %2273 = vmatpush3.bf16.xpose.msra.mxu1 %v2645_v18 }
 0x15d   :  { %2253 = vmatprep.subr.bf16.mxu0 %v2314_v3  ;;  %2274 = vmatprep.subr.bf16.mxu1 %v2314_v3 }
 0x15e   :  { %2004 = vmatprep.mubr.msk.f32.mxu1 %vm2315_vm0, %v2316_v11  ;;  %v2257_v11 = vpack.c.bf16 %v875_v38, %v868_v33 }
 0x164   :  { %2255 = vmatpush3.bf16.xpose.msra.mxu0 %v2254_v55  ;;  %2276 = vmatpush3.bf16.xpose.msra.mxu1 %v2674_v52  ;;  %v2263_v52 = vpack.c.bf16 %v903_v51, %v896_v50 }
 0x165   :  { %2256 = vmatprep.subr.bf16.mxu0 %v2314_v3  ;;  %2277 = vmatprep.subr.bf16.mxu1 %v2314_v3 }
 0x166   :  { %v433_v6 = vpop.f32.mrb[2].mxu0 }
 0x167   :  { %v434_v9 = vadd.f32 %v433_v6, %v330_v5  ;;  %v1691_v10 = vpop.f32.mrb[3].mxu0 }
 0x16c   :  { %2258 = vmatpush3.bf16.xpose.msra.mxu0 %v2257_v11  ;;  %2279 = vmatpush3.bf16.xpose.msra.mxu1 %v2694_v8 }
 0x16d   :  { %2259 = vmatprep.subr.bf16.mxu0 %v2314_v3  ;;  %2280 = vmatprep.subr.bf16.mxu1 %v2314_v3 }
 0x16e   :  { %v522_v17 = vpop.f32.mrb[2].mxu1 }
 0x16f   :  { %v523_v18 = vadd.f32 %v522_v17, %v434_v9  ;;  %v1726_v37 = vpop.f32.mrb[3].mxu1 }
 0x174   :  { %2261 = vmatpush3.bf16.xpose.msra.mxu0 %v2260_v44  ;;  %2282 = vmatpush3.bf16.xpose.msra.mxu1 %v2721_v43 }
 0x175   :  { %2262 = vmatprep.subr.bf16.mxu0 %v2314_v3  ;;  %2283 = vmatprep.subr.bf16.mxu1 %v2314_v3 }
 0x17c   :  { %2264 = vmatpush3.bf16.xpose.msra.mxu0 %v2263_v52  ;;  %2285 = vmatpush3.bf16.xpose.msra.mxu1 %v2750_v34 }
 0x17d   :  { %2265 = vmatprep.subr.bf16.mxu0 %v2314_v3  ;;  %2286 = vmatprep.subr.bf16.mxu1 %v2314_v3 }
 0x184   :  { %2267 = vmatpush3.bf16.xpose.msra.mxu0 %v2266_v54  ;;  %2288 = vmatpush3.bf16.xpose.msra.mxu1 %v2766_v62 }
 0x185   :  { %2268 = vmatprep.subr.bf16.mxu0 %v2314_v3  ;;  %2289 = vmatprep.subr.bf16.mxu1 %v2314_v3 }
 0x18c   :  { %2270 = vmatpush3.bf16.xpose.msra.mxu0 %v2269_v57  ;;  %2291 = vmatpush3.bf16.xpose.msra.mxu1 %v2789_v26 }
 0x18d   :  { %2292 = vmatprep.subr.bf16.mxu1 %v2314_v3 }
 0x193   :  { %1970 = vmatmul.mubr.f32.vlgmr.msra.gmra.mrb[10].mxu0 %v2791_v12 }
 0x194   :  { %2294 = vmatpush3.bf16.xpose.msra.mxu1 %v2812_v53 }
 0x19b   :  { %2005 = vmatmul.mubr.f32.vlgmr.msra.gmra.mrb[10].mxu1 %v2791_v12 }
 0x1a6   :  { %v641_v2 = vpop.f32.mrb[4].mxu0 }
 0x1a7   :  { %v642_v7 = vadd.f32 %v641_v2, %v523_v18  ;;  %v1761_v8 = vpop.f32.mrb[5].mxu0 }
 0x1ae   :  { %v728_v20 = vpop.f32.mrb[4].mxu1 }
 0x1af   :  { %v729_v21 = vadd.f32 %v728_v20, %v642_v7  ;;  %v1796_v33 = vpop.f32.mrb[5].mxu1 }
 0x1e6   :  { %v819_v38 = vpop.f32.mrb[6].mxu0 }
 0x1e7   :  { %v820_v39 = vadd.f32 %v819_v38, %v729_v21  ;;  %v1831_v40 = vpop.f32.mrb[7].mxu0 }
 0x1ee   :  { %v970_v43 = vpop.f32.mrb[6].mxu1 }
 0x1ef   :  { %v971_v25 = vadd.f32 %v970_v43, %v820_v39  ;;  %v1866_v41 = vpop.f32.mrb[7].mxu1 }
 0x226   :  { %v1074_v59 = vpop.f32.mrb[8].mxu0 }
 0x227   :  { %v1075_v3 = vadd.f32 %v1074_v59, %v971_v25  ;;  %v1901_v4 = vpop.f32.mrb[9].mxu0 }
 0x22e   :  { %v1163_v34 = vpop.f32.mrb[8].mxu1 }
 0x22f   :  { %v1164_v50 = vadd.f32 %v1163_v34, %v1075_v3  ;;  %v1936_v51 = vpop.f32.mrb[9].mxu1 }
 0x266   :  { %v1282_v62 = vpop.f32.mrb[10].mxu0 }
 0x267   :  { %v1283_v61 = vadd.f32 %v1282_v62, %v1164_v50  ;;  %v1971_v22 = vpop.f32.mrb[11].mxu0 }
 0x26e   :  { %v1369_v16 = vpop.f32.mrb[10].mxu1 }
 0x26f   :  { %v1370_v26 = vadd.f32 %v1369_v16, %v1283_v61  ;;  %v2006_v12 = vpop.f32.mrb[11].mxu1 }
 0x271   :  { %v1374_v42 = vadd.f32 %v1381_v15, %v1370_v26 }
 0x273   :  { %1375 = vst [vmem:[%s2947_s6] sm:$0xff] %v1374_v42 }
 0x274   :  { %1380 = vsyncpa [#allocation3], 1 }

</bundles_post_ra>
